<compile_context>
chip_gen: v7x
topology: tpu7x:2x2x1
jax: 0.10.0
libtpu: 0.0.40
codegen_flags: <defaults>
</compile_context>

<pallas_src>
import functools

import jax
import jax.numpy as jnp
from jax.experimental import pallas as pl
from jax.experimental.pallas import tpu as pltpu


# ---------------------------------------------------------------------------
# Kernels
# ---------------------------------------------------------------------------

def _rmsnorm_kernel(x_ref, o_ref, *, eps: float):
    """RMSNorm without affine (gain=1, bias=0)."""
    x = x_ref[...].astype(jnp.float32)                       # (tile, d)
    mean_sq = jnp.mean(x * x, axis=-1, keepdims=True)        # (tile, 1)
    rms = jnp.sqrt(mean_sq)
    # Per-row inverse on the (tile, 1) vector instead of a D-wide divide.
    inv = pl.reciprocal(rms + eps, approx=False)              # (tile, 1)
    o_ref[...] = (x * inv).astype(o_ref.dtype)


def _rmsnorm_affine_kernel(x_ref, gain_ref, bias_ref, o_ref, *, eps: float):
    """RMSNorm with affine gain/bias (broadcast over rows)."""
    x = x_ref[...].astype(jnp.float32)                       # (tile, d)
    mean_sq = jnp.mean(x * x, axis=-1, keepdims=True)        # (tile, 1)
    rms = jnp.sqrt(mean_sq)
    inv = pl.reciprocal(rms + eps, approx=False)              # (tile, 1)
    g = gain_ref[...].astype(jnp.float32)                     # (1, d), resident block
    b = bias_ref[...].astype(jnp.float32)                     # (1, d)
    o_ref[...] = ((x * inv) * g + b).astype(o_ref.dtype)


# ---------------------------------------------------------------------------
# Tile / VMEM sizing
# ---------------------------------------------------------------------------

_TARGET_BLOCK_BYTES = 8 << 20   # ~8 MiB per (single) buffer: amortizes grid-step overhead


def _vmem_limit_bytes() -> int:
    """Scoped VMEM to request: most of physical capacity with headroom."""
    try:
        cap = int(pltpu.get_tpu_info().vmem_capacity_bytes)   # 128 MiB v5e/v6e, 64 MiB v7x
    except Exception:
        cap = 64 * 1024 * 1024                                 # conservative (v7x per-TC)
    return max(32 * 1024 * 1024, cap - 16 * 1024 * 1024)


def _pick_row_tile(rows: int, d: int, in_itemsize: int, out_itemsize: int,
                   vmem_limit: int, affine: bool) -> int:
    """Largest legal row tile fitting double-buffered blocks, capped near 8 MiB/block."""
    param_bytes = (4 * d * 4) if affine else 0                 # gain+bias, double-buffered
    budget = vmem_limit - param_bytes - (2 << 20)              # 2 MiB slack
    per_row_db = 2 * d * (in_itemsize + out_itemsize)          # 2x for double-buffering
    tile = max(1, budget // per_row_db)
    # Cap single-buffer block size (~8 MiB) and absolute row count.
    cap_rows = max(8, _TARGET_BLOCK_BYTES // max(1, d * max(in_itemsize, out_itemsize)))
    tile = min(tile, cap_rows, 8192)
    if tile >= rows:
        return rows                                            # block dim == full array dim
    return max(8, (tile // 8) * 8)                             # sublane-legal; ragged tail ok


# ---------------------------------------------------------------------------
# Wrapper
# ---------------------------------------------------------------------------

def rmsnorm(x, gain=None, bias=None, *, eps: float = 1e-8, out_dtype=None,
            row_tile: int | None = None):
    """RMSNorm over the last dim of x (b, seq_len, emb_dim).

    gain/bias=None corresponds to the module's affine=False path (identity affine).
    out_dtype defaults to float32 to match the module's forward; pass x.dtype for
    bf16/f16 inputs to halve the store traffic on this memory-bound kernel.
    """
    b, s, d = x.shape
    rows = b * s
    out_dtype = jnp.float32 if out_dtype is None else out_dtype
    x2 = x.reshape(rows, d)

    affine = (gain is not None) or (bias is not None)
    if affine:
        gain2 = (jnp.ones((d,), jnp.float32) if gain is None else gain).reshape(1, d)
        bias2 = (jnp.zeros((d,), jnp.float32) if bias is None else bias).reshape(1, d)

    vmem_limit = _vmem_limit_bytes()
    if row_tile is not None:
        tile = rows if row_tile >= rows else max(8, (row_tile // 8) * 8)
    else:
        tile = _pick_row_tile(rows, d,
                              jnp.dtype(x.dtype).itemsize,
                              jnp.dtype(out_dtype).itemsize,
                              vmem_limit, affine)
    grid = (pl.cdiv(rows, tile),)

    in_specs = [pl.BlockSpec((tile, d), lambda i: (i, 0))]     # x rows
    args = [x2]
    if affine:
        in_specs += [pl.BlockSpec((1, d), lambda i: (0, 0)),   # gain (resident)
                     pl.BlockSpec((1, d), lambda i: (0, 0))]   # bias (resident)
        args += [gain2, bias2]
        kernel = functools.partial(_rmsnorm_affine_kernel, eps=eps)
    else:
        kernel = functools.partial(_rmsnorm_kernel, eps=eps)

    out = pl.pallas_call(
        kernel,
        out_shape=jax.ShapeDtypeStruct((rows, d), out_dtype),
        grid_spec=pltpu.PrefetchScalarGridSpec(
            num_scalar_prefetch=0,
            grid=grid,
            in_specs=in_specs,
            out_specs=pl.BlockSpec((tile, d), lambda i: (i, 0)),
        ),
        compiler_params=pltpu.CompilerParams(
            dimension_semantics=("parallel",),
            vmem_limit_bytes=int(vmem_limit),
        ),
    )(*args)

    return out.reshape(b, s, d)


# ---------------------------------------------------------------------------
# Demo / correctness check
# ---------------------------------------------------------------------------

if __name__ == "__main__":
    key = jax.random.PRNGKey(0)
    b, seq_len, emb_dim = 2, 8, 128   # emb_dim multiple of 128 -> lane-dense stores
    eps = 1e-8

    k1, k2, k3 = jax.random.split(key, 3)
    x = jax.random.normal(k1, (b, seq_len, emb_dim), dtype=jnp.float32)
    gain = 1.0 + 0.1 * jax.random.normal(k2, (emb_dim,), dtype=jnp.float32)
    bias = 0.1 * jax.random.normal(k3, (emb_dim,), dtype=jnp.float32)

    # affine=False path (module default: gain=ones, bias=zeros -> identity affine).
    out_plain = rmsnorm(x, eps=eps)
    # affine=True path.
    out_affine = rmsnorm(x, gain, bias, eps=eps)
    # Forced multi-tile path (exercises the grid / ragged-tail handling).
    out_tiled = rmsnorm(x, gain, bias, eps=eps, row_tile=8)
    out_plain, out_affine, out_tiled = jax.block_until_ready(
        (out_plain, out_affine, out_tiled))

    # Reference (same semantics as the PyTorch forward).
    xf = x.astype(jnp.float32)
    rms = jnp.sqrt(jnp.mean(jnp.square(xf), axis=-1, keepdims=True))
    norm = xf / (rms + eps)
    ref_plain = norm
    ref_affine = norm * gain + bias

    assert out_plain.shape == (b, seq_len, emb_dim)
    assert out_plain.dtype == jnp.float32
    assert out_affine.shape == (b, seq_len, emb_dim)
    assert out_affine.dtype == jnp.float32
    assert jnp.allclose(out_plain, ref_plain, atol=1e-5, rtol=1e-5)
    assert jnp.allclose(out_affine, ref_affine, atol=1e-5, rtol=1e-5)
    assert jnp.allclose(out_tiled, ref_affine, atol=1e-5, rtol=1e-5)

    print("KERNEL_OK")
</pallas_src>

<mosaic_0001>
module attributes {stable_mosaic.version = 11 : i64} {
  func.func @_rmsnorm_kernel(%arg0: i32, %arg1: memref<16x128xf32, #tpu.memory_space<vmem>>, %arg2: memref<16x128xf32, #tpu.memory_space<vmem>>) attributes {dimension_semantics = [#tpu.dimension_semantics<parallel>], iteration_bounds = array<i64: 1>, scalar_prefetch = 0 : i64, scratch_operands = 0 : i64, tpu.core_type = #tpu.core_type<tc>, window_params = [{transform_indices = @transform_0, window_bounds = array<i64: 16, 128>}, {transform_indices = @transform_1, window_bounds = array<i64: 16, 128>}]} {
    %c0 = arith.constant 0 : index
    %c0_0 = arith.constant 0 : index
    %0 = vector.load %arg1[%c0, %c0_0] : memref<16x128xf32, #tpu.memory_space<vmem>>, vector<16x128xf32>
    %1 = arith.mulf %0, %0 : vector<16x128xf32>
    %cst = arith.constant dense<0.000000e+00> : vector<16xf32>
    %2 = vector.multi_reduction <add>, %1, %cst [1] : vector<16x128xf32> to vector<16xf32>
    %3 = vector.shape_cast %2 : vector<16xf32> to vector<16x1xf32>
    %cst_1 = arith.constant 1.280000e+02 : f32
    %4 = vector.broadcast %cst_1 : f32 to vector<16x1xf32>
    %5 = arith.divf %3, %4 : vector<16x1xf32>
    %6 = math.sqrt %5 : vector<16x1xf32>
    %cst_2 = arith.constant 9.99999993E-9 : f32
    %7 = vector.broadcast %cst_2 : f32 to vector<16x1xf32>
    %8 = arith.addf %6, %7 : vector<16x1xf32>
    %9 = tpu.reciprocal %8 : vector<16x1xf32> -> vector<16x1xf32>
    %10 = vector.broadcast %9 : vector<16x1xf32> to vector<16x128xf32>
    %11 = arith.mulf %0, %10 : vector<16x128xf32>
    %c0_3 = arith.constant 0 : index
    %c0_4 = arith.constant 0 : index
    %12 = vector.load %arg2[%c0_3, %c0_4] : memref<16x128xf32, #tpu.memory_space<vmem>>, vector<16x128xf32>
    tpu.vector_store %arg2[%c0_3, %c0_4], %11 {strides = array<i32>} : memref<16x128xf32, #tpu.memory_space<vmem>>, vector<16x128xf32>,
    return
  }
  func.func @transform_0(%arg0: i32) -> (i32, i32) {
    %c0_i32 = arith.constant 0 : i32
    %c0_i32_0 = arith.constant 0 : i32
    return %arg0, %c0_i32 : i32, i32
  }
  func.func @transform_1(%arg0: i32) -> (i32, i32) {
    %c0_i32 = arith.constant 0 : i32
    %c0_i32_0 = arith.constant 0 : i32
    return %arg0, %c0_i32 : i32, i32
  }
}

</mosaic_0001>

<bundles_post_ra>
// kernel: tpu_custom_call.1
= control target key start
LH: loop header
LB: loop body
LE: loop exit
PB: predicated region body
PF: predicated region fallthrough
CT: control target
= control target key end

     0   :  { %6 = vsyncpa [#allocation3], 0  ;;  %s177_s0 = inlined_call_operand.hbm [shape: f32[16,128], index: 0, kind: input, shape index: {}]   ;;  %s178_s1 = inlined_call_operand.hbm [shape: f32[16,128], index: 1, kind: output, shape index: {}]  }
   0x1   :  { %7 = vsyncpa [#allocation4], 0  ;;  %s133_s6 = smov [#allocation2]   ;;  %s85_s10 = scalar_lea.hbm %s177_s0, 256 }
   0x2   :  { %s13_s7 = sshll.u32 %s133_s6, 4  ;;  %p86_p0 = scmp.ne.s32.totalorder %s177_s0, %s85_s10  ;;  %s14_s7 = int_to_ptr.vmem [resolvable:$true] %s13_s7 }
   0x3   :  { %p89_p1 = scmp.lt.u32.totalorder %s85_s10, %s177_s0 }
   0x5   :  { %p91_p2 = pnand %p89_p1, %p86_p0 }
   0x7   :  { %94 = shalt.err (!%p91_p2)
}
   0x8   :  { %s95_s15 = scalar_lea.vmem %s14_s7, 256  ;;  %p100_p4 = scmp.lt.s32.totalorder %s14_s7, %s14_s7 }
   0x9   :  { %p96_p3 = scmp.ne.s32.totalorder %s14_s7, %s95_s15  ;;  %p101_p5 = scmp.lt.s32.totalorder %s95_s15, %s95_s15 }
   0xb   :  { %p102_p6 = por %p101_p5, %p100_p4 }
   0xd   :  { %p103_p7 = pnand %p102_p6, %p96_p3 }
   0xf   :  { %106 = shalt.err (!%p103_p7)
}
  0x10   :  { %s134_s16 = smov 128   ;;  %s135_s17 = smov 8  }
  0x11   :  { %19 = dma.hbm_to_vmem [thread:$0]  %s177_s0, 256, %s14_s7, [#allocation3], %s134_s16, %s134_s16, %s135_s17  }
  0x12   :  { %129 = dma.done.wait [#allocation3], 256  }
  0x13   :  { %130 = vsyncadd [#allocation3], 4294967040  ;;  %v23_v0 = vld [vmem:[#allocation2] sm:$0xff]  ;;  %v24_v1 = vld [vmem:[#allocation2 + $0x8] sm:$0xff]  ;;  %s136_s0 = smov [#allocation5]  }
  0x14   :  { %v25_v2 = vmul.f32 %v23_v0, %v23_v0  ;;  %v26_v3 = vmul.f32 %v24_v1, %v24_v1  ;;  %s61_s20 = sshll.u32 %s136_s0, 4  ;;  %s62_s20 = int_to_ptr.vmem [resolvable:$true] %s61_s20 }
  0x15   :  { %s107_s21 = scalar_lea.vmem %s62_s20, 256  ;;  %p112_p9 = scmp.lt.s32.totalorder %s62_s20, %s62_s20 }
  0x16   :  { %27 = vadd.xlane.f32.xlu0 %v25_v2  ;;  %p108_p8 = scmp.ne.s32.totalorder %s62_s20, %s107_s21  ;;  %p113_p10 = scmp.lt.s32.totalorder %s107_s21, %s107_s21 }
  0x18   :  { %p114_p11 = por %p113_p10, %p112_p9 }
  0x1a   :  { %29 = vadd.xlane.f32.xlu0 %v26_v3  ;;  %p115_p12 = pnand %p114_p11, %p108_p8 }
  0xa3   :  { %v28_v4 = vpop.xlane.xlu0 %27 }
  0xa4   :  { %v32_v5 = vmul.f32 0.0078125, %v28_v4 }
  0xa6   :  { %77 = vrsqrt.f32 %v32_v5  ;;  %vm36_vm0 = vcmp.eq.f32.partialorder %v32_v5, inf  ;;  %v39_v10 = vand.u32 2147483648, %v32_v5  ;;  %vm38_vm1 = vcmp.eq.f32.partialorder %v32_v5, 0.0 }
  0xa7   :  { %v30_v6 = vpop.xlane.xlu0 %29 }
  0xa8   :  { %v33_v7 = vmul.f32 0.0078125, %v30_v6 }
  0xaa   :  { %79 = vrsqrt.f32 %v33_v7  ;;  %vm43_vm2 = vcmp.eq.f32.partialorder %v33_v7, inf  ;;  %v46_v16 = vand.u32 2147483648, %v33_v7  ;;  %vm45_vm3 = vcmp.eq.f32.partialorder %v33_v7, 0.0 }
  0xb0   :  { %v78_v8 = vpop.eup %77 }
  0xb1   :  { %v35_v9 = vmul.f32 %v78_v8, %v32_v5 }
  0xb3   :  { %v37_v11 = vsel %vm36_vm0, %v32_v5, %v35_v9 }
  0xb4   :  { %v80_v12 = vpop.eup %79  ;;  %v40_v13 = vsel %vm38_vm1, %v39_v10, %v37_v11 }
  0xb5   :  { %v42_v14 = vmul.f32 %v80_v12, %v33_v7  ;;  %v48_v15 = vadd.f32 1e-08, %v40_v13 }
  0xb7   :  { %v44_v17 = vsel %vm43_vm2, %v33_v7, %v42_v14  ;;  %81 = vrcp.f32 %v48_v15 }
  0xb8   :  { %v47_v18 = vsel %vm45_vm3, %v46_v16, %v44_v17 }
  0xb9   :  { %v49_v19 = vadd.f32 1e-08, %v47_v18 }
  0xbb   :  { %83 = vrcp.f32 %v49_v19 }
  0xc1   :  { %v82_v20 = vpop.eup %81 }
  0xc2   :  { %v52_v21 = vmul.f32 %v82_v20, %v23_v0 }
  0xc4   :  { %54 = vst [vmem:[#allocation5] sm:$0xff] %v52_v21 }
  0xc5   :  { %v84_v22 = vpop.eup %83 }
  0xc6   :  { %v53_v23 = vmul.f32 %v84_v22, %v24_v1 }
  0xc8   :  { %55 = vst [vmem:[#allocation5 + $0x8] sm:$0xff] %v53_v23 }
  0xc9   :  { %118 = shalt.err (!%p115_p12)
}
  0xca   :  { %s119_s24 = scalar_lea.hbm %s178_s1, 256 }
  0xcb   :  { %p120_p13 = scmp.ne.s32.totalorder %s178_s1, %s119_s24  ;;  %p123_p0 = scmp.lt.u32.totalorder %s119_s24, %s178_s1 }
  0xcd   :  { %p125_p1 = pnand %p123_p0, %p120_p13 }
  0xcf   :  { %128 = shalt.err (!%p125_p1)
}
  0xd0   :  { %67 = dma.vmem_to_hbm [thread:$0]  %s62_s20, 256, %s178_s1, [#allocation4], %s134_s16, %s134_s16, %s135_s17  }
  0xd1   :  { %131 = dma.done.wait [#allocation4], 256  }
  0xd2   :  { %132 = vsyncadd [#allocation4], 4294967040 }
  0xd3   :  { %71 = vsyncpa [#allocation3], 1 }
  0xd4   :  { %72 = vsyncpa [#allocation4], 1 }

</bundles_post_ra>
